<compile_context>
chip_gen: v6e
topology: v6e:2x2x1
jax: 0.10.0
libtpu: 0.0.40
codegen_flags: <defaults>
</compile_context>

<pallas_src>
import functools

import jax
import jax.numpy as jnp
from jax.experimental import pallas as pl
from jax.experimental.pallas import tpu as pltpu


# ----------------------------------------------------------------------------
# Kernel
# ----------------------------------------------------------------------------
def _sll_block_kernel(x_ref, mask_ref, wa_ref, wb_ref, b_ref, o_ref, scr_ref, *,
                      img_w, n_groups, matmul_dtype):
    """One SLL block per grid step; o_ref carries the activation across depth.

    x_ref:    (C, N)                input activations (read only at depth 0)
    mask_ref: (8, N) matmul_dtype   boundary masks for the 8 non-center taps
                                    (resident across the whole grid)
    wa_ref:   (n_groups, C, tpg*C)  conv weight slab        wa[g, o, j*C + i]
    wb_ref:   (n_groups, C, tpg*C)  scaled conv^T slab      wb[g, i, j*C + o]
                                    (2/t folded in)
    b_ref:    (depth, C, 1)         bias table (resident, indexed by depth)
    o_ref:    (C, N)                carried activation / final output
    scr_ref:  (tpg*C, N) matmul_dtype  reused im2col scratch
    """
    d = pl.program_id(1)

    # Depth step 0: seed the carried activation with the input block.
    @pl.when(d == 0)
    def _():
        o_ref[...] = x_ref[...]

    cur = o_ref[...]                      # (C, N) float32
    C, n = cur.shape
    tpg = 9 // n_groups
    offsets = [dy * img_w + dx for dy in (-1, 0, 1) for dx in (-1, 0, 1)]

    def conv3x3(v_f32, w_ref):
        # Cast ONCE before the 9-tap expansion; rolls, mask multiplies and the
        # im2col scratch all stay in matmul_dtype (half VMEM in the bf16 path).
        v = v_f32.astype(matmul_dtype)
        acc = None
        for g in range(n_groups):
            for j in range(tpg):
                tap = g * tpg + j
                off = offsets[tap]
                dst = slice(j * C, (j + 1) * C)
                if off == 0:
                    scr_ref[dst, :] = v
                else:
                    s = pltpu.roll(v, shift=(-off) % n, axis=1)  # s[p]=v[p+off]
                    m = tap if tap < 4 else tap - 1              # skip center
                    scr_ref[dst, :] = s * mask_ref[m:m + 1, :]
            part = jnp.dot(w_ref[g], scr_ref[...],
                           preferred_element_type=jnp.float32)
            acc = part if acc is None else acc + part
        return acc

    bias = b_ref[d]                       # (C, 1) float32, resident table
    # h = ReLU(K (x) x + b)   (the 1/t scale is folded into wb)
    z = conv3x3(cur, wa_ref)
    h = jnp.maximum(z + bias, 0.0)
    # out = x - K^T (x) ((2/t) . h)
    r = conv3x3(h, wb_ref)
    o_ref[...] = cur - r


# ----------------------------------------------------------------------------
# Parameter / tiling glue (plain JAX, tiny)
# ----------------------------------------------------------------------------
def _compute_t(k, q):
    """SLL T diag: t_i = sum_j exp(q_j - q_i) * sum_{u,v} |(K_i * K_j)[u,v]|."""
    ktk = jnp.abs(jax.lax.conv_general_dilated(
        k, k, window_strides=(1, 1), padding=((2, 2), (2, 2)),
        dimension_numbers=("NCHW", "OIHW", "NCHW")))          # (C, C, 5, 5)
    qe = jnp.exp(q)
    t = jnp.sum(ktk.sum(axis=(2, 3)) * (qe[None, :] / qe[:, None]), axis=1)
    # Guard against a degenerate all-zero kernel channel (t == 0 -> inf/nan).
    return jnp.maximum(t, 1e-12)


def _make_tap_masks(H, W, batch_tile, dtype):
    """(8, batch_tile*H*W) masks for the 8 non-center taps (0/1 values)."""
    idx = jnp.arange(H * W, dtype=jnp.int32)
    row, col = idx // W, idx % W
    masks = []
    for dy in (-1, 0, 1):
        for dx in (-1, 0, 1):
            if dy == 0 and dx == 0:
                continue
            ok = ((col + dx >= 0) & (col + dx < W) &
                  (row + dy >= 0) & (row + dy < H))
            masks.append(ok)
    m = jnp.stack(masks).astype(dtype)                     # (8, H*W)
    return jnp.tile(m, (1, batch_tile))                    # (8, batch_tile*H*W)


def _tpu_vmem_capacity_bytes():
    default = 128 * 1024 * 1024
    try:
        info = pltpu.get_tpu_info()
    except Exception:
        return default
    for attr in ("vmem_capacity_bytes", "vmem_size_bytes", "vmem_bytes"):
        v = getattr(info, attr, None)
        if isinstance(v, int) and v > 0:
            return v
    return default


def _estimate_vmem_bytes(C, nblk, depth, tpg, mm_bytes):
    f32 = 4
    est = 0
    est += 2 * 2 * C * nblk * f32            # x + out blocks (double buffered)
    est += 2 * 8 * nblk * mm_bytes           # mask block
    est += 2 * 2 * C * 9 * C * mm_bytes      # wa + wb slabs (double buffered)
    est += 2 * depth * C * f32               # bias table
    est += tpg * C * nblk * mm_bytes         # reused im2col scratch
    est += 2 * C * nblk * mm_bytes           # casted operands (live ranges)
    est += 4 * C * nblk * f32                # cur / z / h / r temporaries
    return est


def _pick_batch_tile(B, C, H, W, depth, tpg, mm_bytes, budget):
    """Largest batch_tile that fits the VMEM budget; keep >=2 batch tiles when
    possible so v7x's two TensorCores (and megacore) get parallel work."""
    min_tiles = 2 if B >= 2 else 1
    divisors = [bt for bt in range(1, B + 1) if B % bt == 0]
    legal = [bt for bt in divisors if (bt * H * W) % 128 == 0]
    assert legal, "batch_tile*H*W must be a multiple of 128 for some divisor of B"
    fitting = [bt for bt in legal
               if _estimate_vmem_bytes(C, bt * H * W, depth, tpg, mm_bytes) <= budget]
    if not fitting:
        return legal[0]
    pref = [bt for bt in fitting if B // bt >= min_tiles]
    return max(pref) if pref else max(fitting)


# ----------------------------------------------------------------------------
# Forward
# ----------------------------------------------------------------------------
def liconvsll_forward(x_nchw, kernels, biases, qs, *,
                      matmul_dtype=jnp.float32, batch_tile=None):
    """LiConvSLL forward.  x_nchw: (B, C, H, W) as in PyTorch.

    matmul_dtype=jnp.bfloat16 is a valid (and recommended) MXU-operand choice
    on ALL generations (v5e/v6e/v7x); accumulation stays f32.
    """
    depth, c_out, c_in, kh, kw = kernels.shape
    assert c_out == c_in and kh == 3 and kw == 3
    C = c_out
    B, cx, H, W = x_nchw.shape
    assert cx == C

    # Small C: the kernel is XLU/VPU/store-bound, not MXU-bound -> grouped taps.
    n_groups = 3 if C <= 32 else 1
    tpg = 9 // n_groups
    mm_bytes = jnp.dtype(matmul_dtype).itemsize

    # Generation-aware VMEM budgeting (v7x: 64 MiB physical; v5e/v6e: 128 MiB).
    phys = _tpu_vmem_capacity_bytes()
    if phys <= 96 * 2**20:
        vmem_limit = min(40 * 2**20, int(phys * 5 // 8))
    else:
        vmem_limit = 96 * 2**20

    if batch_tile is None:
        batch_tile = _pick_batch_tile(B, C, H, W, depth, tpg, mm_bytes,
                                      budget=int(vmem_limit * 0.7))
    assert B % batch_tile == 0
    nblk = batch_tile * H * W
    assert nblk % 128 == 0, "batch_tile*H*W must be a multiple of 128"

    # ---- parameter glue (tiny, plain JAX) ----------------------------------
    kernels = kernels.astype(jnp.float32)
    t = jnp.stack([_compute_t(kernels[d], qs[d].astype(jnp.float32))
                   for d in range(depth)])                     # (depth, C)

    # Conv slab, grouped over taps: wa[d, g, o, j*C + i] = K[d, o, i, a, b]
    # with tap = g*tpg + j, a = tap // 3, b = tap % 3.
    wa = jnp.transpose(kernels, (0, 1, 3, 4, 2)).reshape(depth, C, 9, C)
    wa = wa.reshape(depth, C, n_groups, tpg, C)
    wa = jnp.transpose(wa, (0, 2, 1, 3, 4)).reshape(depth, n_groups, C, tpg * C)
    # Transposed-conv slab with the 2/t scale folded in:
    # wb[d, g, i, j*C + o] = K[d, o, i, 2-a, 2-b] * 2 / t[d, o].
    kflip = jnp.flip(kernels, axis=(3, 4)) * (2.0 / t)[:, :, None, None, None]
    wb = jnp.transpose(kflip, (0, 2, 3, 4, 1)).reshape(depth, C, 9, C)
    wb = wb.reshape(depth, C, n_groups, tpg, C)
    wb = jnp.transpose(wb, (0, 2, 1, 3, 4)).reshape(depth, n_groups, C, tpg * C)
    wa = wa.astype(matmul_dtype)
    wb = wb.astype(matmul_dtype)
    bvec = biases.astype(jnp.float32).reshape(depth, C, 1)

    # Precomputed boundary masks (resident for the whole kernel).
    masks = _make_tap_masks(H, W, batch_tile, matmul_dtype)    # (8, nblk)

    # Channel-major, lane-dense activations: (C, B*H*W).
    x_cm = jnp.transpose(x_nchw.astype(jnp.float32),
                         (1, 0, 2, 3)).reshape(C, B * H * W)

    kern = functools.partial(_sll_block_kernel, img_w=W, n_groups=n_groups,
                             matmul_dtype=matmul_dtype)

    out_cm = pl.pallas_call(
        kern,
        out_shape=jax.ShapeDtypeStruct((C, B * H * W), jnp.float32),
        grid_spec=pltpu.PrefetchScalarGridSpec(
            num_scalar_prefetch=0,
            grid=(B // batch_tile, depth),
            in_specs=[
                pl.BlockSpec((C, nblk), lambda b, d: (0, b)),              # x
                pl.BlockSpec((8, nblk), lambda b, d: (0, 0)),              # masks
                pl.BlockSpec((None, n_groups, C, tpg * C),
                             lambda b, d: (d, 0, 0, 0)),                   # wa
                pl.BlockSpec((None, n_groups, C, tpg * C),
                             lambda b, d: (d, 0, 0, 0)),                   # wb
                pl.BlockSpec((depth, C, 1), lambda b, d: (0, 0, 0)),       # bias
            ],
            out_specs=pl.BlockSpec((C, nblk), lambda b, d: (0, b)),
            scratch_shapes=[pltpu.VMEM((tpg * C, nblk), matmul_dtype)],
        ),
        input_output_aliases={0: 0},   # x and out alias (depth-carried block)
        compiler_params=pltpu.CompilerParams(
            dimension_semantics=("parallel", "arbitrary"),
            vmem_limit_bytes=vmem_limit),
    )(x_cm, masks, wa, wb, bvec)

    return jnp.transpose(out_cm.reshape(C, B, H, W), (1, 0, 2, 3))


# ----------------------------------------------------------------------------
# Pure-JAX reference
# ----------------------------------------------------------------------------
def liconvsll_reference(x_nchw, kernels, biases, qs):
    depth = kernels.shape[0]
    dn = ("NCHW", "OIHW", "NCHW")
    x = x_nchw.astype(jnp.float32)
    for d in range(depth):
        k = kernels[d].astype(jnp.float32)
        t = _compute_t(k, qs[d].astype(jnp.float32))
        res = jax.lax.conv_general_dilated(
            x, k, window_strides=(1, 1), padding=((1, 1), (1, 1)),
            dimension_numbers=dn)
        res = (res + biases[d][None, :, None, None]) / t[None, :, None, None]
        res = jnp.maximum(res, 0.0)
        # conv_transpose2d(res, k, padding=1) == conv2d(res, kt, padding=1)
        # with kt[i, o, a, b] = k[o, i, 2-a, 2-b].
        kt = jnp.flip(jnp.transpose(k, (1, 0, 2, 3)), axis=(2, 3))
        res = 2.0 * jax.lax.conv_general_dilated(
            res, kt, window_strides=(1, 1), padding=((1, 1), (1, 1)),
            dimension_numbers=dn)
        x = x - res
    return x


if __name__ == "__main__":
    # Small deterministic problem: B=2, width(C)=8, H=W=16, depth=3.
    B, C, H, W, DEPTH = 2, 8, 16, 16, 3

    key = jax.random.PRNGKey(0)
    kx, kk, kb, kq = jax.random.split(key, 4)
    x = jax.random.normal(kx, (B, C, H, W), dtype=jnp.float32)
    kernels = 0.2 * jax.random.normal(kk, (DEPTH, C, C, 3, 3), dtype=jnp.float32)
    biases = 0.1 * jax.random.normal(kb, (DEPTH, C), dtype=jnp.float32)
    qs = 0.3 * jax.random.normal(kq, (DEPTH, C), dtype=jnp.float32)

    ref = jax.block_until_ready(liconvsll_reference(x, kernels, biases, qs))

    # f32 MXU-operand path, auto batch_tile — strict tolerance.
    out = jax.block_until_ready(
        liconvsll_forward(x, kernels, biases, qs, matmul_dtype=jnp.float32))
    assert out.shape == (B, C, H, W)
    err = float(jnp.max(jnp.abs(out - ref)))
    assert jnp.allclose(out, ref, rtol=1e-4, atol=1e-4), err

    # batch_tile > 1 path: cross-image roll wrap-around must be fully masked.
    out_bt2 = jax.block_until_ready(
        liconvsll_forward(x, kernels, biases, qs, matmul_dtype=jnp.float32,
                          batch_tile=2))
    err_bt2 = float(jnp.max(jnp.abs(out_bt2 - ref)))
    assert jnp.allclose(out_bt2, ref, rtol=1e-4, atol=1e-4), err_bt2

    # bf16 MXU-operand / f32-accumulate path (valid on v5e/v6e/v7x).
    out_bf16 = jax.block_until_ready(
        liconvsll_forward(x, kernels, biases, qs, matmul_dtype=jnp.bfloat16))
    err_bf16 = float(jnp.max(jnp.abs(out_bf16 - ref)))
    assert err_bf16 < 1e-1, err_bf16

    print("KERNEL_OK")
</pallas_src>

<mosaic_0001>
module attributes {stable_mosaic.version = 11 : i64} {
  func.func @_sll_block_kernel(%arg0: i32, %arg1: i32, %arg2: memref<8x256xf32, #tpu.memory_space<vmem>>, %arg3: memref<8x256xf32, #tpu.memory_space<vmem>>, %arg4: memref<1x3x8x24xf32, #tpu.memory_space<vmem>>, %arg5: memref<1x3x8x24xf32, #tpu.memory_space<vmem>>, %arg6: memref<3x8x1xf32, #tpu.memory_space<vmem>>, %arg7: memref<8x256xf32, #tpu.memory_space<vmem>>, %arg8: memref<24x256xf32, #tpu.memory_space<vmem>>) attributes {dimension_semantics = [#tpu.dimension_semantics<parallel>, #tpu.dimension_semantics<arbitrary>], iteration_bounds = array<i64: 2, 3>, scalar_prefetch = 0 : i64, scratch_operands = 1 : i64, tpu.core_type = #tpu.core_type<tc>, window_params = [{transform_indices = @transform_0, window_bounds = array<i64: 8, 256>}, {pipeline_mode = #tpu.pipeline_mode<synchronous>, transform_indices = @transform_1, window_bounds = array<i64: 8, 256>}, {transform_indices = @transform_2, window_bounds = array<i64: 1, 3, 8, 24>}, {transform_indices = @transform_3, window_bounds = array<i64: 1, 3, 8, 24>}, {pipeline_mode = #tpu.pipeline_mode<synchronous>, transform_indices = @transform_4, window_bounds = array<i64: 3, 8, 1>}, {transform_indices = @transform_5, window_bounds = array<i64: 8, 256>}]} {
    %c0_i32 = arith.constant 0 : i32
    %0 = arith.cmpi eq, %arg1, %c0_i32 : i32
    %1 = arith.extui %0 : i1 to i32
    %c0_i32_0 = arith.constant 0 : i32
    %2 = arith.cmpi ne, %1, %c0_i32_0 : i32
    scf.if %2 {
      %c0_115 = arith.constant 0 : index
      %c0_116 = arith.constant 0 : index
      %123 = vector.load %arg2[%c0_115, %c0_116] : memref<8x256xf32, #tpu.memory_space<vmem>>, vector<8x256xf32>
      %c0_117 = arith.constant 0 : index
      %c0_118 = arith.constant 0 : index
      %124 = vector.load %arg7[%c0_117, %c0_118] : memref<8x256xf32, #tpu.memory_space<vmem>>, vector<8x256xf32>
      tpu.vector_store %arg7[%c0_117, %c0_118], %123 {strides = array<i32>} : memref<8x256xf32, #tpu.memory_space<vmem>>, vector<8x256xf32>,
    } else {
    }
    %c0 = arith.constant 0 : index
    %c0_1 = arith.constant 0 : index
    %3 = vector.load %arg7[%c0, %c0_1] : memref<8x256xf32, #tpu.memory_space<vmem>>, vector<8x256xf32>
    %4 = arith.index_cast %arg1 : i32 to index
    %c0_2 = arith.constant 0 : index
    %c0_3 = arith.constant 0 : index
    %5 = vector.load %arg6[%4, %c0_2, %c0_3] : memref<3x8x1xf32, #tpu.memory_space<vmem>>, vector<1x8x1xf32>
    %6 = vector.shape_cast %5 : vector<1x8x1xf32> to vector<8x1xf32>
    %c17_i32 = arith.constant 17 : i32
    %7 = tpu.dynamic_rotate %3 by %c17_i32 dim 1 : vector<8x256xf32>, i32 -> vector<8x256xf32>
    %c0_4 = arith.constant 0 : index
    %c0_5 = arith.constant 0 : index
    %8 = vector.load %arg3[%c0_4, %c0_5] : memref<8x256xf32, #tpu.memory_space<vmem>>, vector<1x256xf32>
    %9 = vector.broadcast %8 : vector<1x256xf32> to vector<8x256xf32>
    %10 = arith.mulf %7, %9 : vector<8x256xf32>
    %c0_6 = arith.constant 0 : index
    %c0_7 = arith.constant 0 : index
    %11 = vector.load %arg8[%c0_6, %c0_7] : memref<24x256xf32, #tpu.memory_space<vmem>>, vector<8x256xf32>
    tpu.vector_store %arg8[%c0_6, %c0_7], %10 {strides = array<i32>} : memref<24x256xf32, #tpu.memory_space<vmem>>, vector<8x256xf32>,
    %c16_i32 = arith.constant 16 : i32
    %12 = tpu.dynamic_rotate %3 by %c16_i32 dim 1 : vector<8x256xf32>, i32 -> vector<8x256xf32>
    %c1 = arith.constant 1 : index
    %c0_8 = arith.constant 0 : index
    %13 = vector.load %arg3[%c1, %c0_8] : memref<8x256xf32, #tpu.memory_space<vmem>>, vector<1x256xf32>
    %14 = vector.broadcast %13 : vector<1x256xf32> to vector<8x256xf32>
    %15 = arith.mulf %12, %14 : vector<8x256xf32>
    %c8 = arith.constant 8 : index
    %c0_9 = arith.constant 0 : index
    %16 = vector.load %arg8[%c8, %c0_9] : memref<24x256xf32, #tpu.memory_space<vmem>>, vector<8x256xf32>
    tpu.vector_store %arg8[%c8, %c0_9], %15 {strides = array<i32>} : memref<24x256xf32, #tpu.memory_space<vmem>>, vector<8x256xf32>,
    %c15_i32 = arith.constant 15 : i32
    %17 = tpu.dynamic_rotate %3 by %c15_i32 dim 1 : vector<8x256xf32>, i32 -> vector<8x256xf32>
    %c2 = arith.constant 2 : index
    %c0_10 = arith.constant 0 : index
    %18 = vector.load %arg3[%c2, %c0_10] : memref<8x256xf32, #tpu.memory_space<vmem>>, vector<1x256xf32>
    %19 = vector.broadcast %18 : vector<1x256xf32> to vector<8x256xf32>
    %20 = arith.mulf %17, %19 : vector<8x256xf32>
    %c16 = arith.constant 16 : index
    %c0_11 = arith.constant 0 : index
    %21 = vector.load %arg8[%c16, %c0_11] : memref<24x256xf32, #tpu.memory_space<vmem>>, vector<8x256xf32>
    tpu.vector_store %arg8[%c16, %c0_11], %20 {strides = array<i32>} : memref<24x256xf32, #tpu.memory_space<vmem>>, vector<8x256xf32>,
    %c0_12 = arith.constant 0 : index
    %c0_13 = arith.constant 0 : index
    %c0_14 = arith.constant 0 : index
    %c0_15 = arith.constant 0 : index
    %22 = vector.load %arg4[%c0_12, %c0_13, %c0_14, %c0_15] : memref<1x3x8x24xf32, #tpu.memory_space<vmem>>, vector<1x1x8x24xf32>
    %23 = vector.shape_cast %22 : vector<1x1x8x24xf32> to vector<8x24xf32>
    %c0_16 = arith.constant 0 : index
    %c0_17 = arith.constant 0 : index
    %24 = vector.load %arg8[%c0_16, %c0_17] : memref<24x256xf32, #tpu.memory_space<vmem>>, vector<24x256xf32>
    %cst = arith.constant dense<0.000000e+00> : vector<8x256xf32>
    %25 = tpu.matmul %23, %24, %cst {dimension_numbers = #tpu.dot_dimension_numbers<[1], [0], [0], [1], [0, 0, 1, 1], [], []>} : vector<8x24xf32>, vector<24x256xf32>, vector<8x256xf32> -> vector<8x256xf32>
    %c1_i32 = arith.constant 1 : i32
    %26 = tpu.dynamic_rotate %3 by %c1_i32 dim 1 : vector<8x256xf32>, i32 -> vector<8x256xf32>
    %c3 = arith.constant 3 : index
    %c0_18 = arith.constant 0 : index
    %27 = vector.load %arg3[%c3, %c0_18] : memref<8x256xf32, #tpu.memory_space<vmem>>, vector<1x256xf32>
    %28 = vector.broadcast %27 : vector<1x256xf32> to vector<8x256xf32>
    %29 = arith.mulf %26, %28 : vector<8x256xf32>
    %c0_19 = arith.constant 0 : index
    %c0_20 = arith.constant 0 : index
    %30 = vector.load %arg8[%c0_19, %c0_20] : memref<24x256xf32, #tpu.memory_space<vmem>>, vector<8x256xf32>
    tpu.vector_store %arg8[%c0_19, %c0_20], %29 {strides = array<i32>} : memref<24x256xf32, #tpu.memory_space<vmem>>, vector<8x256xf32>,
    %c8_21 = arith.constant 8 : index
    %c0_22 = arith.constant 0 : index
    %31 = vector.load %arg8[%c8_21, %c0_22] : memref<24x256xf32, #tpu.memory_space<vmem>>, vector<8x256xf32>
    tpu.vector_store %arg8[%c8_21, %c0_22], %3 {strides = array<i32>} : memref<24x256xf32, #tpu.memory_space<vmem>>, vector<8x256xf32>,
    %c255_i32 = arith.constant 255 : i32
    %32 = tpu.dynamic_rotate %3 by %c255_i32 dim 1 : vector<8x256xf32>, i32 -> vector<8x256xf32>
    %c4 = arith.constant 4 : index
    %c0_23 = arith.constant 0 : index
    %33 = vector.load %arg3[%c4, %c0_23] : memref<8x256xf32, #tpu.memory_space<vmem>>, vector<1x256xf32>
    %34 = vector.broadcast %33 : vector<1x256xf32> to vector<8x256xf32>
    %35 = arith.mulf %32, %34 : vector<8x256xf32>
    %c16_24 = arith.constant 16 : index
    %c0_25 = arith.constant 0 : index
    %36 = vector.load %arg8[%c16_24, %c0_25] : memref<24x256xf32, #tpu.memory_space<vmem>>, vector<8x256xf32>
    tpu.vector_store %arg8[%c16_24, %c0_25], %35 {strides = array<i32>} : memref<24x256xf32, #tpu.memory_space<vmem>>, vector<8x256xf32>,
    %c0_26 = arith.constant 0 : index
    %c1_27 = arith.constant 1 : index
    %c0_28 = arith.constant 0 : index
    %c0_29 = arith.constant 0 : index
    %37 = vector.load %arg4[%c0_26, %c1_27, %c0_28, %c0_29] : memref<1x3x8x24xf32, #tpu.memory_space<vmem>>, vector<1x1x8x24xf32>
    %38 = vector.shape_cast %37 : vector<1x1x8x24xf32> to vector<8x24xf32>
    %c0_30 = arith.constant 0 : index
    %c0_31 = arith.constant 0 : index
    %39 = vector.load %arg8[%c0_30, %c0_31] : memref<24x256xf32, #tpu.memory_space<vmem>>, vector<24x256xf32>
    %cst_32 = arith.constant dense<0.000000e+00> : vector<8x256xf32>
    %40 = tpu.matmul %38, %39, %cst_32 {dimension_numbers = #tpu.dot_dimension_numbers<[1], [0], [0], [1], [0, 0, 1, 1], [], []>} : vector<8x24xf32>, vector<24x256xf32>, vector<8x256xf32> -> vector<8x256xf32>
    %41 = arith.addf %25, %40 : vector<8x256xf32>
    %c241_i32 = arith.constant 241 : i32
    %42 = tpu.dynamic_rotate %3 by %c241_i32 dim 1 : vector<8x256xf32>, i32 -> vector<8x256xf32>
    %c5 = arith.constant 5 : index
    %c0_33 = arith.constant 0 : index
    %43 = vector.load %arg3[%c5, %c0_33] : memref<8x256xf32, #tpu.memory_space<vmem>>, vector<1x256xf32>
    %44 = vector.broadcast %43 : vector<1x256xf32> to vector<8x256xf32>
    %45 = arith.mulf %42, %44 : vector<8x256xf32>
    %c0_34 = arith.constant 0 : index
    %c0_35 = arith.constant 0 : index
    %46 = vector.load %arg8[%c0_34, %c0_35] : memref<24x256xf32, #tpu.memory_space<vmem>>, vector<8x256xf32>
    tpu.vector_store %arg8[%c0_34, %c0_35], %45 {strides = array<i32>} : memref<24x256xf32, #tpu.memory_space<vmem>>, vector<8x256xf32>,
    %c240_i32 = arith.constant 240 : i32
    %47 = tpu.dynamic_rotate %3 by %c240_i32 dim 1 : vector<8x256xf32>, i32 -> vector<8x256xf32>
    %c6 = arith.constant 6 : index
    %c0_36 = arith.constant 0 : index
    %48 = vector.load %arg3[%c6, %c0_36] : memref<8x256xf32, #tpu.memory_space<vmem>>, vector<1x256xf32>
    %49 = vector.broadcast %48 : vector<1x256xf32> to vector<8x256xf32>
    %50 = arith.mulf %47, %49 : vector<8x256xf32>
    %c8_37 = arith.constant 8 : index
    %c0_38 = arith.constant 0 : index
    %51 = vector.load %arg8[%c8_37, %c0_38] : memref<24x256xf32, #tpu.memory_space<vmem>>, vector<8x256xf32>
    tpu.vector_store %arg8[%c8_37, %c0_38], %50 {strides = array<i32>} : memref<24x256xf32, #tpu.memory_space<vmem>>, vector<8x256xf32>,
    %c239_i32 = arith.constant 239 : i32
    %52 = tpu.dynamic_rotate %3 by %c239_i32 dim 1 : vector<8x256xf32>, i32 -> vector<8x256xf32>
    %c7 = arith.constant 7 : index
    %c0_39 = arith.constant 0 : index
    %53 = vector.load %arg3[%c7, %c0_39] : memref<8x256xf32, #tpu.memory_space<vmem>>, vector<1x256xf32>
    %54 = vector.broadcast %53 : vector<1x256xf32> to vector<8x256xf32>
    %55 = arith.mulf %52, %54 : vector<8x256xf32>
    %c16_40 = arith.constant 16 : index
    %c0_41 = arith.constant 0 : index
    %56 = vector.load %arg8[%c16_40, %c0_41] : memref<24x256xf32, #tpu.memory_space<vmem>>, vector<8x256xf32>
    tpu.vector_store %arg8[%c16_40, %c0_41], %55 {strides = array<i32>} : memref<24x256xf32, #tpu.memory_space<vmem>>, vector<8x256xf32>,
    %c0_42 = arith.constant 0 : index
    %c2_43 = arith.constant 2 : index
    %c0_44 = arith.constant 0 : index
    %c0_45 = arith.constant 0 : index
    %57 = vector.load %arg4[%c0_42, %c2_43, %c0_44, %c0_45] : memref<1x3x8x24xf32, #tpu.memory_space<vmem>>, vector<1x1x8x24xf32>
    %58 = vector.shape_cast %57 : vector<1x1x8x24xf32> to vector<8x24xf32>
    %c0_46 = arith.constant 0 : index
    %c0_47 = arith.constant 0 : index
    %59 = vector.load %arg8[%c0_46, %c0_47] : memref<24x256xf32, #tpu.memory_space<vmem>>, vector<24x256xf32>
    %cst_48 = arith.constant dense<0.000000e+00> : vector<8x256xf32>
    %60 = tpu.matmul %58, %59, %cst_48 {dimension_numbers = #tpu.dot_dimension_numbers<[1], [0], [0], [1], [0, 0, 1, 1], [], []>} : vector<8x24xf32>, vector<24x256xf32>, vector<8x256xf32> -> vector<8x256xf32>
    %61 = arith.addf %41, %60 : vector<8x256xf32>
    %62 = vector.broadcast %6 : vector<8x1xf32> to vector<8x256xf32>
    %63 = arith.addf %61, %62 : vector<8x256xf32>
    %cst_49 = arith.constant 0.000000e+00 : f32
    %64 = vector.broadcast %cst_49 : f32 to vector<8x256xf32>
    %65 = arith.maximumf %63, %64 : vector<8x256xf32>
    %c17_i32_50 = arith.constant 17 : i32
    %66 = tpu.dynamic_rotate %65 by %c17_i32_50 dim 1 : vector<8x256xf32>, i32 -> vector<8x256xf32>
    %c0_51 = arith.constant 0 : index
    %c0_52 = arith.constant 0 : index
    %67 = vector.load %arg3[%c0_51, %c0_52] : memref<8x256xf32, #tpu.memory_space<vmem>>, vector<1x256xf32>
    %68 = vector.broadcast %67 : vector<1x256xf32> to vector<8x256xf32>
    %69 = arith.mulf %66, %68 : vector<8x256xf32>
    %c0_53 = arith.constant 0 : index
    %c0_54 = arith.constant 0 : index
    %70 = vector.load %arg8[%c0_53, %c0_54] : memref<24x256xf32, #tpu.memory_space<vmem>>, vector<8x256xf32>
    tpu.vector_store %arg8[%c0_53, %c0_54], %69 {strides = array<i32>} : memref<24x256xf32, #tpu.memory_space<vmem>>, vector<8x256xf32>,
    %c16_i32_55 = arith.constant 16 : i32
    %71 = tpu.dynamic_rotate %65 by %c16_i32_55 dim 1 : vector<8x256xf32>, i32 -> vector<8x256xf32>
    %c1_56 = arith.constant 1 : index
    %c0_57 = arith.constant 0 : index
    %72 = vector.load %arg3[%c1_56, %c0_57] : memref<8x256xf32, #tpu.memory_space<vmem>>, vector<1x256xf32>
    %73 = vector.broadcast %72 : vector<1x256xf32> to vector<8x256xf32>
    %74 = arith.mulf %71, %73 : vector<8x256xf32>
    %c8_58 = arith.constant 8 : index
    %c0_59 = arith.constant 0 : index
    %75 = vector.load %arg8[%c8_58, %c0_59] : memref<24x256xf32, #tpu.memory_space<vmem>>, vector<8x256xf32>
    tpu.vector_store %arg8[%c8_58, %c0_59], %74 {strides = array<i32>} : memref<24x256xf32, #tpu.memory_space<vmem>>, vector<8x256xf32>,
    %c15_i32_60 = arith.constant 15 : i32
    %76 = tpu.dynamic_rotate %65 by %c15_i32_60 dim 1 : vector<8x256xf32>, i32 -> vector<8x256xf32>
    %c2_61 = arith.constant 2 : index
    %c0_62 = arith.constant 0 : index
    %77 = vector.load %arg3[%c2_61, %c0_62] : memref<8x256xf32, #tpu.memory_space<vmem>>, vector<1x256xf32>
    %78 = vector.broadcast %77 : vector<1x256xf32> to vector<8x256xf32>
    %79 = arith.mulf %76, %78 : vector<8x256xf32>
    %c16_63 = arith.constant 16 : index
    %c0_64 = arith.constant 0 : index
    %80 = vector.load %arg8[%c16_63, %c0_64] : memref<24x256xf32, #tpu.memory_space<vmem>>, vector<8x256xf32>
    tpu.vector_store %arg8[%c16_63, %c0_64], %79 {strides = array<i32>} : memref<24x256xf32, #tpu.memory_space<vmem>>, vector<8x256xf32>,
    %c0_65 = arith.constant 0 : index
    %c0_66 = arith.constant 0 : index
    %c0_67 = arith.constant 0 : index
    %c0_68 = arith.constant 0 : index
    %81 = vector.load %arg5[%c0_65, %c0_66, %c0_67, %c0_68] : memref<1x3x8x24xf32, #tpu.memory_space<vmem>>, vector<1x1x8x24xf32>
    %82 = vector.shape_cast %81 : vector<1x1x8x24xf32> to vector<8x24xf32>
    %c0_69 = arith.constant 0 : index
    %c0_70 = arith.constant 0 : index
    %83 = vector.load %arg8[%c0_69, %c0_70] : memref<24x256xf32, #tpu.memory_space<vmem>>, vector<24x256xf32>
    %cst_71 = arith.constant dense<0.000000e+00> : vector<8x256xf32>
    %84 = tpu.matmul %82, %83, %cst_71 {dimension_numbers = #tpu.dot_dimension_numbers<[1], [0], [0], [1], [0, 0, 1, 1], [], []>} : vector<8x24xf32>, vector<24x256xf32>, vector<8x256xf32> -> vector<8x256xf32>
    %c1_i32_72 = arith.constant 1 : i32
    %85 = tpu.dynamic_rotate %65 by %c1_i32_72 dim 1 : vector<8x256xf32>, i32 -> vector<8x256xf32>
    %c3_73 = arith.constant 3 : index
    %c0_74 = arith.constant 0 : index
    %86 = vector.load %arg3[%c3_73, %c0_74] : memref<8x256xf32, #tpu.memory_space<vmem>>, vector<1x256xf32>
    %87 = vector.broadcast %86 : vector<1x256xf32> to vector<8x256xf32>
    %88 = arith.mulf %85, %87 : vector<8x256xf32>
    %c0_75 = arith.constant 0 : index
    %c0_76 = arith.constant 0 : index
    %89 = vector.load %arg8[%c0_75, %c0_76] : memref<24x256xf32, #tpu.memory_space<vmem>>, vector<8x256xf32>
    tpu.vector_store %arg8[%c0_75, %c0_76], %88 {strides = array<i32>} : memref<24x256xf32, #tpu.memory_space<vmem>>, vector<8x256xf32>,
    %c8_77 = arith.constant 8 : index
    %c0_78 = arith.constant 0 : index
    %90 = vector.load %arg8[%c8_77, %c0_78] : memref<24x256xf32, #tpu.memory_space<vmem>>, vector<8x256xf32>
    tpu.vector_store %arg8[%c8_77, %c0_78], %65 {strides = array<i32>} : memref<24x256xf32, #tpu.memory_space<vmem>>, vector<8x256xf32>,
    %c255_i32_79 = arith.constant 255 : i32
    %91 = tpu.dynamic_rotate %65 by %c255_i32_79 dim 1 : vector<8x256xf32>, i32 -> vector<8x256xf32>
    %c4_80 = arith.constant 4 : index
    %c0_81 = arith.constant 0 : index
    %92 = vector.load %arg3[%c4_80, %c0_81] : memref<8x256xf32, #tpu.memory_space<vmem>>, vector<1x256xf32>
    %93 = vector.broadcast %92 : vector<1x256xf32> to vector<8x256xf32>
    %94 = arith.mulf %91, %93 : vector<8x256xf32>
    %c16_82 = arith.constant 16 : index
    %c0_83 = arith.constant 0 : index
    %95 = vector.load %arg8[%c16_82, %c0_83] : memref<24x256xf32, #tpu.memory_space<vmem>>, vector<8x256xf32>
    tpu.vector_store %arg8[%c16_82, %c0_83], %94 {strides = array<i32>} : memref<24x256xf32, #tpu.memory_space<vmem>>, vector<8x256xf32>,
    %c0_84 = arith.constant 0 : index
    %c1_85 = arith.constant 1 : index
    %c0_86 = arith.constant 0 : index
    %c0_87 = arith.constant 0 : index
    %96 = vector.load %arg5[%c0_84, %c1_85, %c0_86, %c0_87] : memref<1x3x8x24xf32, #tpu.memory_space<vmem>>, vector<1x1x8x24xf32>
    %97 = vector.shape_cast %96 : vector<1x1x8x24xf32> to vector<8x24xf32>
    %c0_88 = arith.constant 0 : index
    %c0_89 = arith.constant 0 : index
    %98 = vector.load %arg8[%c0_88, %c0_89] : memref<24x256xf32, #tpu.memory_space<vmem>>, vector<24x256xf32>
    %cst_90 = arith.constant dense<0.000000e+00> : vector<8x256xf32>
    %99 = tpu.matmul %97, %98, %cst_90 {dimension_numbers = #tpu.dot_dimension_numbers<[1], [0], [0], [1], [0, 0, 1, 1], [], []>} : vector<8x24xf32>, vector<24x256xf32>, vector<8x256xf32> -> vector<8x256xf32>
    %100 = arith.addf %84, %99 : vector<8x256xf32>
    %c241_i32_91 = arith.constant 241 : i32
    %101 = tpu.dynamic_rotate %65 by %c241_i32_91 dim 1 : vector<8x256xf32>, i32 -> vector<8x256xf32>
    %c5_92 = arith.constant 5 : index
    %c0_93 = arith.constant 0 : index
    %102 = vector.load %arg3[%c5_92, %c0_93] : memref<8x256xf32, #tpu.memory_space<vmem>>, vector<1x256xf32>
    %103 = vector.broadcast %102 : vector<1x256xf32> to vector<8x256xf32>
    %104 = arith.mulf %101, %103 : vector<8x256xf32>
    %c0_94 = arith.constant 0 : index
    %c0_95 = arith.constant 0 : index
    %105 = vector.load %arg8[%c0_94, %c0_95] : memref<24x256xf32, #tpu.memory_space<vmem>>, vector<8x256xf32>
    tpu.vector_store %arg8[%c0_94, %c0_95], %104 {strides = array<i32>} : memref<24x256xf32, #tpu.memory_space<vmem>>, vector<8x256xf32>,
    %c240_i32_96 = arith.constant 240 : i32
    %106 = tpu.dynamic_rotate %65 by %c240_i32_96 dim 1 : vector<8x256xf32>, i32 -> vector<8x256xf32>
    %c6_97 = arith.constant 6 : index
    %c0_98 = arith.constant 0 : index
    %107 = vector.load %arg3[%c6_97, %c0_98] : memref<8x256xf32, #tpu.memory_space<vmem>>, vector<1x256xf32>
    %108 = vector.broadcast %107 : vector<1x256xf32> to vector<8x256xf32>
    %109 = arith.mulf %106, %108 : vector<8x256xf32>
    %c8_99 = arith.constant 8 : index
    %c0_100 = arith.constant 0 : index
    %110 = vector.load %arg8[%c8_99, %c0_100] : memref<24x256xf32, #tpu.memory_space<vmem>>, vector<8x256xf32>
    tpu.vector_store %arg8[%c8_99, %c0_100], %109 {strides = array<i32>} : memref<24x256xf32, #tpu.memory_space<vmem>>, vector<8x256xf32>,
    %c239_i32_101 = arith.constant 239 : i32
    %111 = tpu.dynamic_rotate %65 by %c239_i32_101 dim 1 : vector<8x256xf32>, i32 -> vector<8x256xf32>
    %c7_102 = arith.constant 7 : index
    %c0_103 = arith.constant 0 : index
    %112 = vector.load %arg3[%c7_102, %c0_103] : memref<8x256xf32, #tpu.memory_space<vmem>>, vector<1x256xf32>
    %113 = vector.broadcast %112 : vector<1x256xf32> to vector<8x256xf32>
    %114 = arith.mulf %111, %113 : vector<8x256xf32>
    %c16_104 = arith.constant 16 : index
    %c0_105 = arith.constant 0 : index
    %115 = vector.load %arg8[%c16_104, %c0_105] : memref<24x256xf32, #tpu.memory_space<vmem>>, vector<8x256xf32>
    tpu.vector_store %arg8[%c16_104, %c0_105], %114 {strides = array<i32>} : memref<24x256xf32, #tpu.memory_space<vmem>>, vector<8x256xf32>,
    %c0_106 = arith.constant 0 : index
    %c2_107 = arith.constant 2 : index
    %c0_108 = arith.constant 0 : index
    %c0_109 = arith.constant 0 : index
    %116 = vector.load %arg5[%c0_106, %c2_107, %c0_108, %c0_109] : memref<1x3x8x24xf32, #tpu.memory_space<vmem>>, vector<1x1x8x24xf32>
    %117 = vector.shape_cast %116 : vector<1x1x8x24xf32> to vector<8x24xf32>
    %c0_110 = arith.constant 0 : index
    %c0_111 = arith.constant 0 : index
    %118 = vector.load %arg8[%c0_110, %c0_111] : memref<24x256xf32, #tpu.memory_space<vmem>>, vector<24x256xf32>
    %cst_112 = arith.constant dense<0.000000e+00> : vector<8x256xf32>
    %119 = tpu.matmul %117, %118, %cst_112 {dimension_numbers = #tpu.dot_dimension_numbers<[1], [0], [0], [1], [0, 0, 1, 1], [], []>} : vector<8x24xf32>, vector<24x256xf32>, vector<8x256xf32> -> vector<8x256xf32>
    %120 = arith.addf %100, %119 : vector<8x256xf32>
    %121 = arith.subf %3, %120 : vector<8x256xf32>
    %c0_113 = arith.constant 0 : index
    %c0_114 = arith.constant 0 : index
    %122 = vector.load %arg7[%c0_113, %c0_114] : memref<8x256xf32, #tpu.memory_space<vmem>>, vector<8x256xf32>
    tpu.vector_store %arg7[%c0_113, %c0_114], %121 {strides = array<i32>} : memref<8x256xf32, #tpu.memory_space<vmem>>, vector<8x256xf32>,
    return
  }
  func.func @transform_0(%arg0: i32, %arg1: i32) -> (i32, i32) {
    %c0_i32 = arith.constant 0 : i32
    %c0_i32_0 = arith.constant 0 : i32
    return %c0_i32, %arg0 : i32, i32
  }
  func.func @transform_1(%arg0: i32, %arg1: i32) -> (i32, i32) {
    %c0_i32 = arith.constant 0 : i32
    %c0_i32_0 = arith.constant 0 : i32
    %c0_i32_1 = arith.constant 0 : i32
    return %c0_i32, %c0_i32_0 : i32, i32
  }
  func.func @transform_2(%arg0: i32, %arg1: i32) -> (i32, i32, i32, i32) {
    %c0_i32 = arith.constant 0 : i32
    %c0_i32_0 = arith.constant 0 : i32
    %c0_i32_1 = arith.constant 0 : i32
    %c0_i32_2 = arith.constant 0 : i32
    return %arg1, %c0_i32, %c0_i32_0, %c0_i32_1 : i32, i32, i32, i32
  }
  func.func @transform_3(%arg0: i32, %arg1: i32) -> (i32, i32, i32, i32) {
    %c0_i32 = arith.constant 0 : i32
    %c0_i32_0 = arith.constant 0 : i32
    %c0_i32_1 = arith.constant 0 : i32
    %c0_i32_2 = arith.constant 0 : i32
    return %arg1, %c0_i32, %c0_i32_0, %c0_i32_1 : i32, i32, i32, i32
  }
  func.func @transform_4(%arg0: i32, %arg1: i32) -> (i32, i32, i32) {
    %c0_i32 = arith.constant 0 : i32
    %c0_i32_0 = arith.constant 0 : i32
    %c0_i32_1 = arith.constant 0 : i32
    %c0_i32_2 = arith.constant 0 : i32
    return %c0_i32, %c0_i32_0, %c0_i32_1 : i32, i32, i32
  }
  func.func @transform_5(%arg0: i32, %arg1: i32) -> (i32, i32) {
    %c0_i32 = arith.constant 0 : i32
    %c0_i32_0 = arith.constant 0 : i32
    return %c0_i32, %arg0 : i32, i32
  }
}

</mosaic_0001>

<bundles_post_ra>
// kernel: tpu_custom_call.1
= control target key start
LH: loop header
LB: loop body
LE: loop exit
PB: predicated region body
PF: predicated region fallthrough
CT: control target
= control target key end

     0   :  { %s2212_s0 = inlined_call_operand.hbm [shape: f32[8,512], index: 0, kind: input, shape index: {}, may-alias: {0,5}]   ;;  %s2213_s1 = inlined_call_operand.vmem [shape: f32[8,256], index: 1, kind: input, shape index: {}]   ;;  %s2214_s2 = inlined_call_operand.vmem [shape: f32[3,3,8,24], index: 2, kind: input, shape index: {}]   ;;  %s2215_s3 = inlined_call_operand.hbm [shape: f32[3,3,8,24], index: 3, kind: input, shape index: {}]   ;;  %s2216_s4 = inlined_call_operand.vmem [shape: f32[3,8,1], index: 4, kind: input, shape index: {}]   ;;  %s2217_s5 = inlined_call_operand.hbm [shape: f32[8,512], index: 5, kind: output, shape index: {}, may-alias: {0,5}]  }
   0x1   :  { %2228 = sst [smem:[#allocation18_spill]] %s2212_s0 }
   0x2   :  { %2229 = sst [smem:[#allocation19_spill]] %s2217_s5 }
   0x3   :  { %10 = vsyncpa [#allocation4], 0 }
   0x4   :  { %12 = vsyncpa [#allocation4 + $0x1], 0 }
   0x5   :  { %13 = vsyncpa [#allocation7], 0 }
   0x6   :  { %15 = vsyncpa [#allocation7 + $0x1], 0 }
   0x7   :  { %16 = vsyncpa [#allocation5], 0 }
   0x8   :  { %18 = vsyncpa [#allocation5 + $0x1], 0  ;;  %s1738_s18 = smov 0   ;;  %s1740_s19 = smov 0  }
   0x9   :  { %s1742_s20 = smov 0   ;;  %s1744_s21 = smov 0  }
   0xa   :  { %s1746_s22 = smov 0   ;;  %s1748_s23 = smov 0  }
   0xb   :  { %s1750_s24 = smov 0   ;;  %s1752_s25 = smov 0  }
   0xc   :  { %s1754_s26 = smov 0   ;;  %s1756_s27 = smov 0  }
   0xd   :  { %s1758_s28 = smov 0  }
   0xe LB: > { %2230 = sst [smem:[#allocation12_spill]] %s1663_s21  ;;  %s1342_s29 = sadd.s32 4294967295, %s1691_s28   ;;  %s1691_s28 = sphi %s1758_s28, %s24_s28   ;;  %s1687_s27 = sphi %s1756_s27, %s2267_s27   ;;  %s1683_s26 = sphi %s1754_s26, %s2266_s26   ;;  %s1679_s25 = sphi %s1752_s25, %s2265_s25   ;;  %s1675_s24 = sphi %s1750_s24, %s2264_s24   ;;  %s1671_s23 = sphi %s1748_s23, %s2263_s23   ;;  %s1667_s22 = sphi %s1746_s22, %s2262_s22   ;;  %s1663_s21 = sphi %s1744_s21, %s2261_s21   ;;  %s1659_s20 = sphi %s1742_s20, %s2260_s20   ;;  %s1655_s19 = sphi %s1740_s19, %s2259_s19   ;;  %s1651_s18 = sphi %s1738_s18, %s2258_s18  }
   0xf   : > { %2231 = sst [smem:[#allocation13_spill]] %s1679_s25  ;;  %s1343_s30 = sadd.s32 4294967294, %s1691_s28  }
  0x10   : > { %2232 = sst [smem:[#allocation14_spill]] %s1691_s28  ;;  %p50_p0 = scmp.ne.s32.totalorder %s1671_s23, %s1667_s22 }
  0x11   : > { %p51_p1 = scmp.eq.s32.totalorder %s1691_s28, 0  ;;  %p56_p2 = scmp.ne.s32.totalorder %s1667_s22, %s1663_s21 }
  0x12   : > { %p57_p3 = scmp.eq.s32.totalorder %s1342_s29, 0  ;;  %p123_p5 = scmp.ne.s32.totalorder %s1659_s20, %s1655_s19 }
  0x13   : > { %p1800_p4 = por %p51_p1, %p50_p0  ;;  %p129_p7 = scmp.ne.s32.totalorder %s1655_s19, %s1651_s18 }
  0x14   : > { %p1806_p6 = por %p57_p3, %p56_p2  ;;  %p1811_p8 = por %p123_p5, %p51_p1 }
  0x15   : > { %p174_p9 = scmp.eq.s32.totalorder %s1342_s29, 5  ;;  %p1815_p10 = por %p129_p7, %p57_p3 }
  0x16   : > { %p180_p11 = scmp.eq.s32.totalorder %s1343_s30, 5  ;;  %p1408_p1 = scmp.lt.s32.totalorder %s1691_s28, 6 }
  0x17   : > { %s2236_s11 = scalar_select %p1815_p10, 1, 0 }
  0x18   : > { %p1819_p12 = por %p174_p9, %p50_p0  ;;  %p1823_p13 = por %p180_p11, %p56_p2 }
  0x19   : > { %s206_s14 = sand.u32 1, %s1671_s23   ;;  %s1385_s15 = sshll.u32 %s1687_s27, 8 }
  0x1a   : > { %s2237_s12 = scalar_select %p1819_p12, 1, 0 }
  0x1b   : > { %s2239_s13 = scalar_select %p1823_p13, 1, 0 }
  0x1c   : > { %2238 = sst [smem:[#allocation15_spill]] %s2237_s12  ;;  %s1346_s16 = sshll.u32 %s206_s14, 4 }
  0x1d   : > { %2240 = sst [smem:[#allocation16_spill]] %s2239_s13  ;;  %s210_s7 = scalar_lea.vmem [#allocation3], %s1346_s16 }
  0x1e   : > { %s2241_s0 = sld [smem:[#allocation18_spill]]  ;;  %s218_s6 = sshll.u32 %s210_s7, 4  ;;  %s219_s6 = int_to_ptr.vmem [resolvable:$true] %s218_s6 }
  0x1f   : > { %p1835_p3 = pnand %p1408_p1, %p1800_p4  ;;  %p1841_p0 = pnand %p1408_p1, %p1811_p8 }
  0x20   : > { %p1350_p2 = scmp.ge.s32.totalorder %s1691_s28, 1  ;;  %s207_s21 = scalar_lea.sflag [#allocation4], %s206_s14 }
  0x21   : > { %p1513_p5 = pneg %p1835_p3  ;;  %s1524_s17 = scalar_lea.vmem %s219_s6, 256 }
  0x22   : > { %p1525_p7 = scmp.ne.s32.totalorder %s219_s6, %s1524_s17  ;;  %s1693_s7 = smov [#allocation3]  }
  0x23   : > { %s1529_s8 = sshll.u32 %s1693_s7, 4  ;;  %s1530_s8 = int_to_ptr.vmem [resolvable:$false] %s1529_s8 }
  0x24   : > { %s216_s29 = scalar_lea.hbm %s2241_s0, %s1385_s15  ;;  %p1527_p9 = pnand %p1525_p7, %p1513_p5 }
  0x25   : > { %s1531_s15 = scalar_lea.vmem %s1530_s8, 512  ;;  %p1532_p4 = scmp.lt.s32.totalorder %s219_s6, %s1530_s8 }
  0x26   : > { %p1528_p11 = pneg %p1527_p9  ;;  %p1533_p13 = scmp.lt.s32.totalorder %s1531_s15, %s1524_s17 }
  0x28   : > { %p1534_p12 = por %p1533_p13, %p1532_p4 }
  0x2a   : > { %p1535_p10 = pnand %p1534_p12, %p1528_p11 }
  0x2c   : > { %1538 = shalt.err (!%p1535_p10)
}
  0x2d   : > { %1400 = dma.hbm_to_vmem [thread:$0]  (!%p1835_p3), %s216_s29, 256, %s219_s6, %s207_s21  }
  0x2e   : > { %p252_p8 = scmp.lt.s32.totalorder %s1691_s28, 7  ;;  %s116_s10 = sadd.s32 1, %s1659_s20 }
  0x2f   : > { %s33_s16 = sadd.s32 1, %s1683_s26  ;;  %s233_s18 = sand.u32 1, %s1659_s20  }
  0x30   : > { %p1854_p13 = pnand %p1350_p2, %p252_p8  ;;  %p34_p10 = scmp.ge.s32.totalorder %s33_s16, 3 }
  0x31   : > { %s1387_s30 = smul.u32 24, %s233_s18  ;;  %s2246_s17 = sadd.s32 1, %s1687_s27 }
  0x32   : > { %s2269_s16 = smov (%p34_p10, %s33_s16), 0  ;;  %s2271_s17 = smov (!%p34_p10, %s2246_s17), %s1687_s27 }
  0x33   : > { %2245 = sst [smem:[#allocation17_spill]] %s2269_s16  ;;  %s113_s21 = ssub.s32 %s1683_s26, %s2269_s16 }
  0x34   : > { %p38_p12 = scmp.ge.s32.totalorder %s2271_s17, 2  ;;  %p114_p1 = scmp.eq.s32.totalorder %s113_s21, 0 }
  0x35   : > { %s1388_s6 = smul.u32 384, %s1683_s26  ;;  %s237_s29 = scalar_lea.vmem [#allocation6], %s1387_s30 }
  0x36   : > { %s244_s7 = sshll.u32 %s237_s29, 4  ;;  %s2273_s17 = smov (%p38_p12, %s2271_s17), 0  ;;  %s245_s7 = int_to_ptr.vmem [resolvable:$true] %s244_s7 }
  0x37   : > { %s1871_s8 = scalar_select %p114_p1, %s1659_s20, %s116_s10  }
  0x38   : > { %s40_s15 = ssub.s32 %s1687_s27, %s2273_s17  ;;  %s243_s5 = scalar_lea.hbm %s2215_s3, %s1388_s6 }
  0x39   : > { %p41_p3 = scmp.eq.s32.totalorder %s40_s15, 0  ;;  %s2247_s12 = sadd.s32 1, %s1671_s23 }
  0x3a   : > { %s234_s16 = scalar_lea.sflag [#allocation7], %s233_s18  ;;  %p1541_p2 = pneg %p1841_p0 }
  0x3b   : > { %s1881_s25 = scalar_select %p41_p3, %s1671_s23, %s2247_s12  }
  0x3c   : > { %s1552_s30 = scalar_lea.vmem %s245_s7, 384  ;;  %s1694_s21 = smov [#allocation6]  }
  0x3d   : > { %p1553_p5 = scmp.ne.s32.totalorder %s245_s7, %s1552_s30  ;;  %s1557_s10 = sshll.u32 %s1694_s21, 4  ;;  %s1558_s10 = int_to_ptr.vmem [resolvable:$false] %s1557_s10 }
  0x3e   : > { %s1559_s29 = scalar_lea.vmem %s1558_s10, 768  ;;  %p1560_p11 = scmp.lt.s32.totalorder %s245_s7, %s1558_s10 }
  0x3f   : > { %p1555_p7 = pnand %p1553_p5, %p1541_p2  ;;  %p1561_p4 = scmp.lt.s32.totalorder %s1559_s29, %s1552_s30 }
  0x41   : > { %p1556_p9 = pneg %p1555_p7  ;;  %p1562_p8 = por %p1561_p4, %p1560_p11 }
  0x43   : > { %p1563_p10 = pnand %p1562_p8, %p1556_p9 }
  0x45   : > { %1566 = shalt.err (!%p1563_p10)
}
  0x46   : > { %s1695_s0 = smov 128   ;;  %s1696_s28 = smov 8  }
  0x47   : > { %1403 = dma.hbm_to_vmem [thread:$0]  (!%p1841_p0), %s243_s5, 384, %s245_s7, %s234_s16, %s1695_s0, %s1695_s0, %s1696_s28  }
  0x48   : > { %256 = sbr.rel (%p1854_p13) target bundleno = 811 (0x32b), region = 40  ;;  %s1890_s12 = sand.u32 (!%p1854_p13), 1, %s1667_s22  }
  0x49   : > { %s1351_s18 = sshll.u32 (!%p1854_p13), %s1890_s12, 4  ;;  %s259_s6 = scalar_lea.sflag (!%p1854_p13), [#allocation4], %s1890_s12 }
  0x4a   : > { %s262_s15 = scalar_lea.vmem (!%p1854_p13), [#allocation3], %s1351_s18 }
  0x4d   : > { %1638 = dma.done.wait (%p1806_p6), %s259_s6, 256  }
  0x4e   : > { %1640 = vsyncadd (%p1806_p6), %s259_s6, 4294967040  ;;  %s267_s5 = sand.u32 1, %s1655_s19   ;;  %p2248_p0 = scmp.ne.s32.totalorder %s2236_s11, 0 }
  0x4f   : > { %s1389_s13 = smul.u32 24, %s267_s5  ;;  %s268_s14 = scalar_lea.sflag [#allocation7], %s267_s5 }
  0x51   : > { %s1899_s16 = scalar_lea.vmem [#allocation6], %s1389_s13 }
  0x52   : > { %1642 = dma.done.wait (%p2248_p0), %s268_s14, 384  }
  0x53   : > { %1644 = vsyncadd (%p2248_p0), %s268_s14, 4294966912  ;;  %p309_p13 = scmp.lt.s32.totalorder %s1675_s24, 2  ;;  %s1912_s29 = scalar_lea.vmem [#allocation8], %s1351_s18 }
  0x54   : > { %p1354_p6 = scmp.ne.s32.totalorder %s1675_s24, 0 }
  0x55   : > { %s310_s7 = scalar_select %p309_p13, %s1675_s24, 2 }
  0x56   : > { %318 = sbr.rel (%p1354_p6) target bundleno = 93 (0x5d), region = 52 }
  0x57   : > { %s1390_s30 = smul.u32 24, %s310_s7 }
  0x59   : > { %s1910_s10 = scalar_lea.vmem %s2214_s2, %s1390_s30 }
  0x5b   : > { %v319_v0 = vld [vmem:[%s262_s15] sm:$0xff]  ;;  %v320_v1 = vld [vmem:[%s262_s15 + $0x8] sm:$0xff] }
  0x5c   : > { %321 = vst [vmem:[%s1912_s29] sm:$0xff] %v319_v0  ;;  %322 = vst [vmem:[%s1912_s29 + $0x8] sm:$0xff] %v320_v1 }
  0x5d PF: > { %s1697_s11 = smov 15   ;;  %s1698_s0 = smov 127   ;;  %v1700_v4 = vmov 0.0   ;;  %v1704_v5 = vmov 0   ;;  %v332_v7 = vlaneseq  ;;  %v1360_v43 = vld [vmem:[%s1910_s10 + $0x8] sm:$0xff]  ;;  %vm466_vm4 = vcmask 195584  }
  0x5e   : > { %s1699_s28 = smov 1   ;;  %534 = vmatprep.mubr.f32.mxu0 %v1700_v4  ;;  %608 = vmatprep.mubr.f32.mxu1 %v1700_v4  ;;  %s1701_s18 = smov 16   ;;  %v1357_v12 = vld [vmem:[%s2213_s1 + $0x2] ss:$8 sm:$0x3] }
  0x5f   : > { %s1702_s6 = smov 111   ;;  %s1703_s15 = smov 17   ;;  %1510 = vset.pattern.permute.xlu0 %v1704_v5  ;;  %v340_v8 = vshrl.u32 %v332_v7, 7  ;;  %v1961_v9 = vand.u32 127, %v332_v7 }
  0x60   : > { %s1355_s5 = sshll.u32 %s1675_s24, 3  ;;  %s1705_s13 = smov 112   ;;  %v1359_v13 = vld [vmem:[%s2213_s1 + $0x4] ss:$8 sm:$0x3] }
  0x61   : > { %s326_s30 = scalar_lea.vmem %s2216_s4, %s1355_s5  ;;  %s1706_s21 = smov 113   ;;  %v1963_v10 = vsub.s32 0, %v340_v8  ;;  %v1965_v11 = vsub.s32 1, %v340_v8  ;;  %vm381_vm0 = vcmp.lt.s32.totalorder %v1961_v9, 15  ;;  %vm438_vm1 = vcmp.lt.s32.totalorder %v1961_v9, 127 }
  0x62   : > { %v327_v6 = vld [vmem:[%s326_s30] sm:$0xff]  ;;  %vm412_vm2 = vcmp.lt.s32.totalorder %v1961_v9, 1  ;;  %vm357_vm3 = vcmp.lt.s32.totalorder %v1961_v9, 16  ;;  %vm667_vm5 = vcmp.lt.s32.totalorder %v1961_v9, 111  ;;  %vm334_vm6 = vcmp.lt.s32.totalorder %v1961_v9, 17  ;;  %s1707_s30 = smov [#allocation8]  }
  0x63   : > { %v1918_v2 = vld [vmem:[%s1912_s29] sm:$0xff]  ;;  %v1925_v3 = vld [vmem:[%s1912_s29 + $0x8] sm:$0xff]  ;;  %v394_v17 = vrot.slane %v1357_v12, %v1965_v11  ;;  %v451_v18 = vrot.slane %v1359_v13, %v1965_v11  ;;  %v447_v19 = vrot.slane %v1359_v13, %v1963_v10  ;;  %v390_v20 = vrot.slane %v1357_v12, %v1963_v10  ;;  %s1571_s24 = sshll.u32 %s1707_s30, 4  ;;  %s1572_s24 = int_to_ptr.vmem [resolvable:$false] %s1571_s24 }
  0x64   : > { %377 = vrot.lane.b32.xlu1 %v1918_v2, %s1697_s11  ;;  %434 = vrot.lane.b32.xlu0 %v1918_v2, %s1698_s0  ;;  %v1358_v16 = vld [vmem:[%s2213_s1 + $0x3] ss:$8 sm:$0x3]  ;;  %v1356_v33 = vld [vmem:[%s2213_s1 + $0x1] ss:$8 sm:$0x3] }
  0x65   : > { %v421_v23 = vrot.slane %v1358_v16, %v1963_v10  ;;  %v425_v24 = vrot.slane %v1358_v16, %v1965_v11  ;;  %v366_v40 = vrot.slane %v1356_v33, %v1963_v10  ;;  %v370_v41 = vrot.slane %v1356_v33, %v1965_v11  ;;  %v1365_v42 = vld [vmem:[%s2213_s1 + $0x7] ss:$8 sm:$0x3]  ;;  %v337_v52 = vld [vmem:[%s2213_s1] ss:$8 sm:$0x3] }
  0x66   : > { %v676_v50 = vrot.slane %v1365_v42, %v1963_v10  ;;  %v680_v51 = vrot.slane %v1365_v42, %v1965_v11  ;;  %v342_v59 = vrot.slane %v337_v52, %v1963_v10  ;;  %v346_v60 = vrot.slane %v337_v52, %v1965_v11  ;;  %v1364_v61 = vld [vmem:[%s2213_s1 + $0x6] ss:$8 sm:$0x3]  ;;  %v1363_v13 = vld [vmem:[%s2213_s1 + $0x5] ss:$8 sm:$0x3] }
  0x67   : > { %vm643_vm7 = vcmp.lt.s32.totalorder %v1961_v9, 112  ;;  %v652_v7 = vrot.slane %v1364_v61, %v1963_v10  ;;  %v656_v8 = vrot.slane %v1364_v61, %v1965_v11  ;;  %v401_v12 = vld [vmem:[%s1910_s10] sm:$0xff]  ;;  %vm619_vm8 = vcmp.lt.s32.totalorder %v1961_v9, 113  ;;  %s1573_s9 = scalar_lea.vmem %s1572_s24, 512 }
  0x68   : > { %379 = vrot.lane.b32.xlu1 %v1925_v3, %s1697_s11  ;;  %436 = vrot.lane.b32.xlu0 %v1925_v3, %s1698_s0 }
  0x6c   : > { %410 = vrot.lane.b32.xlu1 %v1925_v3, %s1699_s28  ;;  %408 = vrot.lane.b32.xlu0 %v1918_v2, %s1699_s28 }
  0x70   : > { %355 = vrot.lane.b32.xlu1 %v1925_v3, %s1701_s18  ;;  %353 = vrot.lane.b32.xlu0 %v1918_v2, %s1701_s18 }
  0x74   : > { %665 = vrot.lane.b32.xlu1 %v1925_v3, %s1702_s6  ;;  %663 = vrot.lane.b32.xlu0 %v1918_v2, %s1702_s6 }
  0x78   : > { %330 = vrot.lane.b32.xlu1 %v1925_v3, %s1703_s15  ;;  %328 = vrot.lane.b32.xlu0 %v1918_v2, %s1703_s15 }
  0x7c   : > { %641 = vrot.lane.b32.xlu1 %v1925_v3, %s1705_s13  ;;  %639 = vrot.lane.b32.xlu0 %v1918_v2, %s1705_s13 }
  0x80   : > { %617 = vrot.lane.b32.xlu1 %v1925_v3, %s1706_s21  ;;  %615 = vrot.lane.b32.xlu0 %v1918_v2, %s1706_s21 }
  0x84   : > { %773 = vperm.xlu0 %1510, %v327_v6  }
  0xd6   : > { %v378_v14 = vpop.permute.xlu1 %377  ;;  %v435_v15 = vpop.permute.xlu0 %434 }
  0xda   : > { %v380_v21 = vpop.permute.xlu1 %379  ;;  %v437_v22 = vpop.permute.xlu0 %436 }
  0xdb   : > { %v383_v25 = vsel %vm381_vm0, %v380_v21, %v378_v14  ;;  %v439_v26 = vsel %vm438_vm1, %v435_v15, %v437_v22  ;;  %v382_v27 = vsel %vm381_vm0, %v378_v14, %v380_v21  ;;  %v440_v28 = vsel %vm438_vm1, %v437_v22, %v435_v15 }
  0xdc   : > { %v398_v29 = vmul.f32 %v394_v17, %v382_v27  ;;  %v455_v30 = vmul.f32 %v451_v18, %v440_v28  ;;  %v454_v31 = vmul.f32 %v447_v19, %v439_v26  ;;  %v397_v32 = vmul.f32 %v390_v20, %v383_v25  ;;  %v1366_v28 = vld [vmem:[%s1910_s10 + $0x10] sm:$0xff] }
  0xdd   : > { %v628_v20 = vrot.slane %v1363_v13, %v1963_v10  ;;  %v632_v21 = vrot.slane %v1363_v13, %v1965_v11 }
  0xde   : > { %570 = vmatprep.subr.mxu1 %v398_v29  ;;  %v411_v34 = vpop.permute.xlu1 %410  ;;  %496 = vmatprep.subr.mxu0 %v455_v30  ;;  %v409_v35 = vpop.permute.xlu0 %408 }
  0xdf   : > { %v413_v36 = vsel %vm412_vm2, %v409_v35, %v411_v34  ;;  %v414_v37 = vsel %vm412_vm2, %v411_v34, %v409_v35  ;;  %497 = vmatpush1.msra.mxu0 %v454_v31  ;;  %571 = vmatpush1.msra.mxu1 %v397_v32 }
  0xe0   : > { %v428_v38 = vmul.f32 %v421_v23, %v414_v37  ;;  %v429_v39 = vmul.f32 %v425_v24, %v413_v36  ;;  %498 = vmatprep.subr.mxu0 %v1925_v3 }
  0xe1   : > { %499 = vmatpush1.msra.mxu0 %v1918_v2 }
  0xe2   : > { %v356_v44 = vpop.permute.xlu1 %355  ;;  %500 = vmatprep.subr.mxu0 %v429_v39  ;;  %v354_v45 = vpop.permute.xlu0 %353 }
  0xe3   : > { %v358_v46 = vsel %vm357_vm3, %v354_v45, %v356_v44  ;;  %v359_v47 = vsel %vm357_vm3, %v356_v44, %v354_v45  ;;  %501 = vmatpush1.msra.mxu0 %v428_v38  ;;  %v1371_v44 = vld [vmem:[%s2213_s1 + $0x4] ss:$8 sm:$0x3] }
  0xe4   : > { %v373_v48 = vmul.f32 %v366_v40, %v359_v47  ;;  %v374_v49 = vmul.f32 %v370_v41, %v358_v46  ;;  %1361 = vmatmul.mubr.msk.f32.vlgmr.msra.gmra.mxu0 %vm466_vm4, %v1360_v43  ;;  %v888_v47 = vrot.slane %v1371_v44, %v1963_v10 }
  0xe5   : > { %762 = vmatprep.mubr.f32.mxu0 %v1700_v4 }
  0xe6   : > { %v666_v53 = vpop.permute.xlu1 %665  ;;  %572 = vmatprep.subr.mxu1 %v374_v49  ;;  %v664_v54 = vpop.permute.xlu0 %663  ;;  %v1369_v49 = vld [vmem:[%s2213_s1 + $0x2] ss:$8 sm:$0x3] }
  0xe7   : > { %v668_v55 = vsel %vm667_vm5, %v664_v54, %v666_v53  ;;  %v669_v56 = vsel %vm667_vm5, %v666_v53, %v664_v54  ;;  %573 = vmatpush1.msra.mxu1 %v373_v48  ;;  %v892_v48 = vrot.slane %v1371_v44, %v1965_v11  ;;  %v846_v44 = vld [vmem:[%s1899_s16] sm:$0xff] }
  0xe8   : > { %v683_v57 = vmul.f32 %v676_v50, %v668_v55  ;;  %v684_v58 = vmul.f32 %v680_v51, %v669_v56  ;;  %v835_v56 = vrot.slane %v1369_v49, %v1963_v10 }
  0xea   : > { %v331_v62 = vpop.permute.xlu1 %330  ;;  %724 = vmatprep.subr.mxu0 %v684_v58  ;;  %v329_v63 = vpop.permute.xlu0 %328  ;;  %v1370_v58 = vld [vmem:[%s2213_s1 + $0x3] ss:$8 sm:$0x3] }
  0xeb   : > { %v335_v0 = vsel %vm334_vm6, %v329_v63, %v331_v62  ;;  %v336_v1 = vsel %vm334_vm6, %v331_v62, %v329_v63  ;;  %725 = vmatpush1.msra.mxu0 %v683_v57  ;;  %v839_v57 = vrot.slane %v1369_v49, %v1965_v11 }
  0xec   : > { %v349_v5 = vmul.f32 %v342_v59, %v336_v1  ;;  %v350_v6 = vmul.f32 %v346_v60, %v335_v0  ;;  %v864_v1 = vrot.slane %v1370_v58, %v1963_v10 }
  0xee   : > { %v642_v14 = vpop.permute.xlu1 %641  ;;  %574 = vmatprep.subr.mxu1 %v350_v6  ;;  %v640_v15 = vpop.permute.xlu0 %639  ;;  %v1368_v6 = vld [vmem:[%s2213_s1 + $0x1] ss:$8 sm:$0x3] }
  0xef   : > { %v644_v16 = vsel %vm643_vm7, %v640_v15, %v642_v14  ;;  %v645_v17 = vsel %vm643_vm7, %v642_v14, %v640_v15  ;;  %575 = vmatpush1.msra.mxu1 %v349_v5  ;;  %v868_v5 = vrot.slane %v1370_v58, %v1965_v11 }
  0xf0   : > { %v659_v18 = vmul.f32 %v652_v7, %v644_v16  ;;  %v660_v19 = vmul.f32 %v656_v8, %v645_v17  ;;  %1362 = vmatmul.mubr.msk.f32.vlgmr.msra.gmra.mxu1 %vm466_vm4, %v401_v12  ;;  %v813_v16 = vrot.slane %v1368_v6, %v1963_v10  ;;  %v817_v17 = vrot.slane %v1368_v6, %v1965_v11 }
  0xf1   : > { %974 = vmatprep.mubr.f32.mxu1 %v1700_v4 }
  0xf2   : > { %v618_v22 = vpop.permute.xlu1 %617  ;;  %726 = vmatprep.subr.mxu0 %v660_v19  ;;  %v616_v23 = vpop.permute.xlu0 %615  ;;  %v1372_v19 = vld [vmem:[%s1899_s16 + $0x8] sm:$0xff] }
  0xf3   : > { %v620_v24 = vsel %vm619_vm8, %v616_v23, %v618_v22  ;;  %v621_v25 = vsel %vm619_vm8, %v618_v22, %v616_v23  ;;  %727 = vmatpush1.msra.mxu0 %v659_v18  ;;  %v1377_v18 = vld [vmem:[%s2213_s1 + $0x7] ss:$8 sm:$0x3] }
  0xf4   : > { %v635_v26 = vmul.f32 %v628_v20, %v620_v24  ;;  %v636_v27 = vmul.f32 %v632_v21, %v621_v25  ;;  %v1110_v25 = vrot.slane %v1377_v18, %v1963_v10 }
  0xf6   : > { %728 = vmatprep.subr.mxu0 %v636_v27  ;;  %v786_v27 = vld [vmem:[%s2213_s1] ss:$8 sm:$0x3] }
  0xf7   : > { %729 = vmatpush1.msra.mxu0 %v635_v26  ;;  %v1114_v26 = vrot.slane %v1377_v18, %v1965_v11 }
  0xf8   : > { %1367 = vmatmul.mubr.msk.f32.vlgmr.msra.gmra.mxu0 %vm466_vm4, %v1366_v28 }
  0xf9   : > { %1048 = vmatprep.mubr.f32.mxu0 %v1700_v4 }
  0xff   : > { %v774_v35 = vpop.permute.xlu0 %773 }
 0x1a4   : > { %v536_v29 = vpop.f32.mrf.mxu0 }
 0x1a6   : > { %v538_v31 = vpop.f32.mrf.mxu0 }
 0x1b0   : > { %v610_v30 = vpop.f32.mrf.mxu1 }
 0x1b1   : > { %v611_v33 = vadd.f32 %v610_v30, %v536_v29 }
 0x1b2   : > { %v612_v32 = vpop.f32.mrf.mxu1 }
 0x1b3   : > { %v613_v36 = vadd.f32 %v612_v32, %v538_v31 }
 0x1b8   : > { %v764_v34 = vpop.f32.mrf.mxu0 }
 0x1b9   : > { %v769_v37 = vadd.f32 %v764_v34, %v611_v33  ;;  %v791_v34 = vrot.slane %v786_v27, %v1963_v10 }
 0x1ba   : > { %v766_v38 = vpop.f32.mrf.mxu0 }
 0x1bb   : > { %v770_v39 = vadd.f32 %v766_v38, %v613_v36  ;;  %v776_v40 = vadd.f32 %v774_v35, %v769_v37 }
 0x1bd   : > { %v777_v41 = vadd.f32 %v774_v35, %v770_v39  ;;  %v778_v42 = vmax.f32 %v776_v40, 0.0  ;;  %v795_v35 = vrot.slane %v786_v27, %v1965_v11 }
 0x1bf   : > { %824 = vrot.lane.b32.xlu0 %v778_v42, %s1697_s11  ;;  %877 = vrot.lane.b32.xlu1 %v778_v42, %s1698_s0  ;;  %v779_v43 = vmax.f32 %v777_v41, 0.0 }
 0x1c3   : > { %853 = vrot.lane.b32.xlu0 %v778_v42, %s1699_s28  ;;  %879 = vrot.lane.b32.xlu1 %v779_v43, %s1698_s0  ;;  %s2250_s0 = sld [smem:[#allocation15_spill]] }
 0x1c7   : > { %802 = vrot.lane.b32.xlu0 %v778_v42, %s1701_s18  ;;  %826 = vrot.lane.b32.xlu1 %v779_v43, %s1697_s11  ;;  %s2249_s11 = sld [smem:[#allocation13_spill]] }
 0x1c9   : > { %p2252_p1 = scmp.ne.s32.totalorder %s2250_s0, 0 }
 0x1cb   : > { %1099 = vrot.lane.b32.xlu0 %v778_v42, %s1702_s6  ;;  %855 = vrot.lane.b32.xlu1 %v779_v43, %s1699_s28 }
 0x1cd   : > { %s1386_s28 = sshll.u32 %s2249_s11, 8 }
 0x1cf   : > { %780 = vrot.lane.b32.xlu0 %v778_v42, %s1703_s15  ;;  %804 = vrot.lane.b32.xlu1 %v779_v43, %s1701_s18  ;;  %s1224_s18 = sshll.u32 %s1912_s29, 4  ;;  %s1225_s18 = int_to_ptr.vmem [resolvable:$true] %s1224_s18 }
 0x1d0   : > { %s1567_s7 = scalar_lea.vmem %s1225_s18, 256  ;;  %p1574_p5 = scmp.lt.s32.totalorder %s1225_s18, %s1572_s24 }
 0x1d1   : > { %p1568_p12 = scmp.ne.s32.totalorder %s1225_s18, %s1567_s7  ;;  %p1575_p7 = scmp.lt.s32.totalorder %s1573_s9, %s1567_s7 }
 0x1d3   : > { %1077 = vrot.lane.b32.xlu0 %v778_v42, %s1705_s13  ;;  %1101 = vrot.lane.b32.xlu1 %v779_v43, %s1702_s6  ;;  %p1569_p3 = pnand %p1568_p12, %p2252_p1  ;;  %p1576_p9 = por %p1575_p7, %p1574_p5 }
 0x1d5   : > { %p1570_p2 = pneg %p1569_p3 }
 0x1d7   : > { %1055 = vrot.lane.b32.xlu0 %v778_v42, %s1706_s21  ;;  %782 = vrot.lane.b32.xlu1 %v779_v43, %s1703_s15  ;;  %s2251_s15 = sld [smem:[#allocation19_spill]]  ;;  %p1577_p11 = pnand %p1576_p9, %p1570_p2 }
 0x1db   : > { %1079 = vrot.lane.b32.xlu1 %v779_v43, %s1705_s13 }
 0x1dd   : > { %s1222_s13 = scalar_lea.hbm %s2251_s15, %s1386_s28 }
 0x1df   : > { %1057 = vrot.lane.b32.xlu1 %v779_v43, %s1706_s21  ;;  %s1210_s21 = scalar_lea.sflag [#allocation5], %s1890_s12 }
 0x231   : > { %v825_v45 = vpop.permute.xlu0 %824  ;;  %v878_v46 = vpop.permute.xlu1 %877 }
 0x235   : > { %v854_v50 = vpop.permute.xlu0 %853  ;;  %v880_v51 = vpop.permute.xlu1 %879 }
 0x236   : > { %v881_v52 = vsel %vm438_vm1, %v878_v46, %v880_v51  ;;  %v882_v53 = vsel %vm438_vm1, %v880_v51, %v878_v46 }
 0x237   : > { %v895_v54 = vmul.f32 %v888_v47, %v881_v52  ;;  %v896_v55 = vmul.f32 %v892_v48, %v882_v53 }
 0x239   : > { %v803_v59 = vpop.permute.xlu0 %802  ;;  %936 = vmatprep.subr.mxu1 %v896_v55  ;;  %v827_v60 = vpop.permute.xlu1 %826 }
 0x23a   : > { %v828_v61 = vsel %vm381_vm0, %v825_v45, %v827_v60  ;;  %v829_v62 = vsel %vm381_vm0, %v827_v60, %v825_v45  ;;  %937 = vmatpush1.msra.mxu1 %v895_v54  ;;  %v1375_v45 = vld [vmem:[%s2213_s1 + $0x5] ss:$8 sm:$0x3] }
 0x23b   : > { %v842_v63 = vmul.f32 %v835_v56, %v829_v62  ;;  %v843_v0 = vmul.f32 %v839_v57, %v828_v61  ;;  %938 = vmatprep.subr.mxu1 %v779_v43  ;;  %v1066_v51 = vrot.slane %v1375_v45, %v1963_v10  ;;  %v1070_v52 = vrot.slane %v1375_v45, %v1965_v11 }
 0x23c   : > { %939 = vmatpush1.msra.mxu1 %v778_v42 }
 0x23d   : > { %1010 = vmatprep.subr.mxu0 %v843_v0  ;;  %v856_v7 = vpop.permute.xlu1 %855  ;;  %v1100_v13 = vpop.permute.xlu0 %1099 }
 0x23e   : > { %v857_v8 = vsel %vm412_vm2, %v854_v50, %v856_v7  ;;  %v858_v12 = vsel %vm412_vm2, %v856_v7, %v854_v50  ;;  %1011 = vmatpush1.msra.mxu0 %v842_v63 }
 0x23f   : > { %v871_v14 = vmul.f32 %v864_v1, %v858_v12  ;;  %v872_v15 = vmul.f32 %v868_v5, %v857_v8 }
 0x241   : > { %940 = vmatprep.subr.mxu1 %v872_v15  ;;  %v805_v20 = vpop.permute.xlu1 %804  ;;  %v781_v28 = vpop.permute.xlu0 %780 }
 0x242   : > { %v806_v21 = vsel %vm357_vm3, %v803_v59, %v805_v20  ;;  %v807_v22 = vsel %vm357_vm3, %v805_v20, %v803_v59  ;;  %941 = vmatpush1.msra.mxu1 %v871_v14  ;;  %v1378_v59 = vld [vmem:[%s1899_s16 + $0x10] sm:$0xff] }
 0x243   : > { %v820_v23 = vmul.f32 %v813_v16, %v807_v22  ;;  %v821_v24 = vmul.f32 %v817_v17, %v806_v21  ;;  %1373 = vmatmul.mubr.msk.f32.vlgmr.msra.gmra.mxu1 %vm466_vm4, %v1372_v19 }
 0x244   : > { %1196 = vmatprep.mubr.f32.mxu1 %v1700_v4  ;;  %v1376_v4 = vld [vmem:[%s2213_s1 + $0x6] ss:$8 sm:$0x3] }
 0x245   : > { %1012 = vmatprep.subr.mxu0 %v821_v24  ;;  %v1102_v29 = vpop.permute.xlu1 %1101  ;;  %v1078_v39 = vpop.permute.xlu0 %1077  ;;  %v1088_v42 = vrot.slane %v1376_v4, %v1963_v10  ;;  %v1092_v43 = vrot.slane %v1376_v4, %v1965_v11 }
 0x246   : > { %v1103_v30 = vsel %vm667_vm5, %v1100_v13, %v1102_v29  ;;  %v1104_v31 = vsel %vm667_vm5, %v1102_v29, %v1100_v13  ;;  %1013 = vmatpush1.msra.mxu0 %v820_v23 }
 0x247   : > { %v1117_v32 = vmul.f32 %v1110_v25, %v1103_v30  ;;  %v1118_v33 = vmul.f32 %v1114_v26, %v1104_v31 }
 0x249   : > { %1158 = vmatprep.subr.mxu1 %v1118_v33  ;;  %v783_v36 = vpop.permute.xlu1 %782  ;;  %v1056_v53 = vpop.permute.xlu0 %1055 }
 0x24a   : > { %v784_v37 = vsel %vm334_vm6, %v781_v28, %v783_v36  ;;  %v785_v38 = vsel %vm334_vm6, %v783_v36, %v781_v28  ;;  %1159 = vmatpush1.msra.mxu1 %v1117_v32 }
 0x24b   : > { %v798_v40 = vmul.f32 %v791_v34, %v785_v38  ;;  %v799_v41 = vmul.f32 %v795_v35, %v784_v37 }
 0x24d   : > { %1014 = vmatprep.subr.mxu0 %v799_v41  ;;  %v1080_v46 = vpop.permute.xlu1 %1079 }
 0x24e   : > { %v1081_v47 = vsel %vm643_vm7, %v1078_v39, %v1080_v46  ;;  %v1082_v48 = vsel %vm643_vm7, %v1080_v46, %v1078_v39  ;;  %1015 = vmatpush1.msra.mxu0 %v798_v40 }
 0x24f   : > { %v1095_v49 = vmul.f32 %v1088_v42, %v1081_v47  ;;  %v1096_v50 = vmul.f32 %v1092_v43, %v1082_v48  ;;  %1374 = vmatmul.mubr.msk.f32.vlgmr.msra.gmra.mxu0 %vm466_vm4, %v846_v44 }
 0x251   : > { %1160 = vmatprep.subr.mxu1 %v1096_v50  ;;  %v1058_v54 = vpop.permute.xlu1 %1057 }
 0x252   : > { %v1059_v55 = vsel %vm619_vm8, %v1056_v53, %v1058_v54  ;;  %v1060_v56 = vsel %vm619_vm8, %v1058_v54, %v1056_v53  ;;  %1161 = vmatpush1.msra.mxu1 %v1095_v49 }
 0x253   : > { %v1073_v57 = vmul.f32 %v1066_v51, %v1059_v55  ;;  %v1074_v58 = vmul.f32 %v1070_v52, %v1060_v56 }
 0x255   : > { %1162 = vmatprep.subr.mxu1 %v1074_v58 }
 0x256   : > { %1163 = vmatpush1.msra.mxu1 %v1073_v57 }
 0x257   : > { %1379 = vmatmul.mubr.msk.f32.vlgmr.msra.gmra.mxu1 %vm466_vm4, %v1378_v59 }
 0x303   : > { %v976_v10 = vpop.f32.mrf.mxu1 }
 0x305   : > { %v978_v60 = vpop.f32.mrf.mxu1 }
 0x30f   : > { %v1050_v11 = vpop.f32.mrf.mxu0 }
 0x310   : > { %v1051_v62 = vadd.f32 %v1050_v11, %v976_v10 }
 0x311   : > { %v1052_v61 = vpop.f32.mrf.mxu0 }
 0x312   : > { %v1053_v63 = vadd.f32 %v1052_v61, %v978_v60 }
 0x317   : > { %v1198_v9 = vpop.f32.mrf.mxu1 }
 0x318   : > { %v1203_v0 = vadd.f32 %v1198_v9, %v1051_v62 }
 0x319   : > { %v1200_v1 = vpop.f32.mrf.mxu1 }
 0x31a   : > { %v1205_v5 = vsub.f32 %v1918_v2, %v1203_v0  ;;  %v1204_v6 = vadd.f32 %v1200_v1, %v1053_v63 }
 0x31c   : > { %1207 = vst [vmem:[%s1912_s29] sm:$0xff] %v1205_v5  ;;  %v1206_v7 = vsub.f32 %v1925_v3, %v1204_v6 }
 0x31e   : > { %1208 = vst [vmem:[%s1912_s29 + $0x8] sm:$0xff] %v1206_v7 }
 0x31f   : > { %1580 = shalt.err (!%p1577_p11)
}
 0x320   : > { %s1581_s5 = scalar_lea.hbm %s1222_s13, 256  ;;  %s1585_s14 = scalar_lea.hbm %s2251_s15, 512 }
 0x321   : > { %p1582_p4 = scmp.ne.s32.totalorder %s1222_s13, %s1581_s5  ;;  %p1586_p0 = scmp.lt.s32.totalorder %s1222_s13, %s2251_s15 }
 0x322   : > { %p1587_p13 = scmp.lt.s32.totalorder %s1585_s14, %s1581_s5 }
 0x323   : > { %p1583_p8 = pnand %p1582_p4, %p2252_p1 }
 0x324   : > { %p1588_p6 = por %p1587_p13, %p1586_p0 }
 0x325   : > { %p1584_p10 = pneg %p1583_p8 }
 0x327   : > { %p1589_p12 = pnand %p1588_p6, %p1584_p10 }
 0x329   : > { %1592 = shalt.err (!%p1589_p12)
}
 0x32a   : > { %1395 = dma.vmem_to_hbm [thread:$0]  (%p2252_p1), %s1225_s18, 256, %s1222_s13, %s1210_s21  }
 0x32b PF: > { %s2253_s28 = sld [smem:[#allocation14_spill]] }
 0x32c   : > { %s2254_s16 = sld [smem:[#allocation12_spill]] }
 0x32d   : > { %s2255_s6 = sld [smem:[#allocation16_spill]] }
 0x331   : > { %p1409_p3 = scmp.ge.s32.totalorder %s2253_s28, 2 }
 0x332   : > { %s1236_s7 = sand.u32 1, %s2254_s16  }
 0x333   : > { %p2256_p2 = scmp.ne.s32.totalorder %s2255_s6, 0  ;;  %s1237_s30 = scalar_lea.sflag [#allocation5], %s1236_s7 }
 0x335   : > { %p1405_p5 = pnand %p1409_p3, %p2256_p2 }
 0x337   : > { %p1406_p7 = pneg %p1405_p5 }
 0x339   : > { %1646 = dma.done.wait (%p1406_p7), %s1237_s30, 256  }
 0x33a   : > { %1648 = vsyncadd (%p1406_p7), %s1237_s30, 4294967040  ;;  %s24_s28 = sadd.s32 1, %s2253_s28   ;;  %s2257_s0 = sld [smem:[#allocation17_spill]] }
 0x33b   : > { %p21_p9 = scmp.ge.s32.totalorder %s24_s28, 8   ;;  %s2258_s18 = smov %s1655_s19 }
 0x33c   : > { %s2259_s19 = smov %s1659_s20  ;;  %s2260_s20 = smov %s1871_s8 }
 0x33d   : > { %s2261_s21 = smov %s1667_s22  ;;  %s2262_s22 = smov %s1671_s23 }
 0x33e   : > { %s2263_s23 = smov %s1881_s25  ;;  %s2264_s24 = smov %s1683_s26 }
 0x33f   : > { %s2265_s25 = smov %s1687_s27  ;;  %s2267_s27 = smov %s2273_s17 }
 0x340   : > { %s2266_s26 = smov %s2257_s0  ;;  %23 = sbr.rel (!%p21_p9) target bundleno = 14 (0xe), region = 117 }
 0x345   :  { %1242 = vsyncpa [#allocation4], 1 }
 0x346   :  { %1244 = vsyncpa [#allocation4 + $0x1], 1 }
 0x347   :  { %1245 = vsyncpa [#allocation7], 1 }
 0x348   :  { %1247 = vsyncpa [#allocation7 + $0x1], 1 }
 0x349   :  { %1248 = vsyncpa [#allocation5], 1 }
 0x34a   :  { %1250 = vsyncpa [#allocation5 + $0x1], 1 }

</bundles_post_ra>
